<compile_context>
chip_gen: v5e
topology: v5e:2x2
jax: 0.10.0
libtpu: 0.0.40
codegen_flags: <defaults>
</compile_context>

<pallas_src>
from functools import partial

import jax
import jax.numpy as jnp
from jax.experimental import pallas as pl
from jax.experimental.pallas import tpu as pltpu

_LANE = 128      # vreg lane width  (last-dim alignment)
_SUBLANE = 8     # vreg sublane width (second-to-last-dim alignment)


def _round_up(x, m):
    return ((x + m - 1) // m) * m


# ---------------------------------------------------------------------------
# Pallas kernel: one lane-dense, transpose-free MXU matmul per batch tile
# ---------------------------------------------------------------------------
def _fused_dynamics_kernel(x_ref, w_ref, o_ref):
    # x: (tb, K_pad)   w: (K_pad, N_pad)  (pre-transposed: in-features major)
    # Contraction on the last dim of x / first dim of w feeds the MXU directly.
    o_ref[...] = jnp.dot(
        x_ref[...], w_ref[...], preferred_element_type=jnp.float32
    ).astype(o_ref.dtype)


# ---------------------------------------------------------------------------
# Weight prep: fuse [W_dyn | W_u], pre-transpose to (in, out), pad lane-dense
# ---------------------------------------------------------------------------
def _prepare_fused_weight(w_dyn, w_u, k_pad, n_pad):
    G = w_dyn.shape[0]
    w = w_dyn if w_u is None else jnp.concatenate([w_dyn, w_u], axis=1)  # (G, K)
    K = w.shape[1]
    w_t = jnp.transpose(w)                                               # (K, G)
    return jnp.pad(w_t, ((0, k_pad - K), (0, n_pad - G)))                # (K_pad, N_pad)


# ---------------------------------------------------------------------------
# Wrapper (jitted; `u is None` resolved structurally at trace time)
# ---------------------------------------------------------------------------
@partial(jax.jit, static_argnames=("max_tile_b",))
def _dynamics_forward_impl(g, u, w_dyn, w_u, *, max_tile_b=256):
    B, G = g.shape

    # Fuse activations along features to match the fused weight.
    x = g if u is None else jnp.concatenate([g, u], axis=1)              # (B, K)
    K = x.shape[1]
    K_pad = _round_up(K, _LANE)
    N_pad = _round_up(G, _LANE)

    w_fused = _prepare_fused_weight(w_dyn, None if u is None else w_u, K_pad, N_pad)

    # Sublane-aligned batch tile; grid over batch, weight VMEM-resident.
    B8 = _round_up(B, _SUBLANE)
    tb = B8 if B8 <= max_tile_b else max_tile_b
    B_pad = _round_up(B8, tb)
    x = jnp.pad(x, ((0, B_pad - B), (0, K_pad - K)))                     # zero rows/cols

    out = pl.pallas_call(
        _fused_dynamics_kernel,
        out_shape=jax.ShapeDtypeStruct((B_pad, N_pad), g.dtype),
        grid_spec=pltpu.PrefetchScalarGridSpec(
            num_scalar_prefetch=0,
            grid=(B_pad // tb,),
            in_specs=[
                pl.BlockSpec((tb, K_pad), lambda i: (i, 0)),      # activation tile streams
                pl.BlockSpec((K_pad, N_pad), lambda i: (0, 0)),   # weight: stays in VMEM
            ],
            out_specs=pl.BlockSpec((tb, N_pad), lambda i: (i, 0)),
        ),
        compiler_params=pltpu.CompilerParams(
            dimension_semantics=("parallel",),   # batch tiles shard across TCs (v7x)
        ),
    )(x, w_fused)

    # TODO(synk): for a multi-step Koopman rollout, add a time grid axis with the
    # weight index_map still returning (0, 0) to amortize weight DMA + launch.
    return out[:B, :G]


def dynamics_forward(g, u, w_dyn, w_u, *, max_tile_b=256):
    """g: (B, G), u: (B, U) or None, w_dyn: (G, G), w_u: (G, U)."""
    return _dynamics_forward_impl(g, u, w_dyn, w_u, max_tile_b=max_tile_b)


# ---------------------------------------------------------------------------
# Deterministic parameter init (mirrors the PyTorch __init__)
# ---------------------------------------------------------------------------
def init_params(key, g_dim, u_dim):
    # u_dynamics: xavier_normal_ on a (g_dim, u_dim) weight
    std = (2.0 / (g_dim + u_dim)) ** 0.5
    w_u = std * jax.random.normal(key, (g_dim, u_dim), dtype=jnp.float32)
    # orthogonalize: W = U @ V^T * 0.8 (thin SVD)
    U, _, Vh = jnp.linalg.svd(w_u, full_matrices=False)
    w_u = (U @ Vh) * 0.8
    # dynamics: (g_dim, g_dim) weight, all 0.001, no bias
    w_dyn = jnp.full((g_dim, g_dim), 0.001, dtype=jnp.float32)
    return w_dyn, w_u


# ---------------------------------------------------------------------------
# Main
# ---------------------------------------------------------------------------
if __name__ == "__main__":
    key = jax.random.PRNGKey(0)
    k_w, k_g, k_u = jax.random.split(key, 3)

    B, G, U = 8, 32, 16  # small shapes consistent with the module

    w_dyn, w_u = init_params(k_w, G, U)
    g = jax.random.normal(k_g, (B, G), dtype=jnp.float32)
    u = jax.random.normal(k_u, (B, U), dtype=jnp.float32)

    # with control input
    out = jax.block_until_ready(dynamics_forward(g, u, w_dyn, w_u))
    ref = g @ w_dyn.T + u @ w_u.T
    assert out.shape == (B, G)
    assert jnp.allclose(out, ref, atol=1e-5, rtol=1e-5)

    # u is None path
    out_nou = jax.block_until_ready(dynamics_forward(g, None, w_dyn, w_u))
    assert jnp.allclose(out_nou, g @ w_dyn.T, atol=1e-5, rtol=1e-5)

    # non-tile-aligned batch (exercise padding + slicing)
    g5 = jax.random.normal(k_g, (5, G), dtype=jnp.float32)
    u5 = jax.random.normal(k_u, (5, U), dtype=jnp.float32)
    out5 = jax.block_until_ready(dynamics_forward(g5, u5, w_dyn, w_u))
    assert jnp.allclose(out5, g5 @ w_dyn.T + u5 @ w_u.T, atol=1e-5, rtol=1e-5)

    # larger batch that spans multiple grid tiles (weight stays VMEM-resident)
    gb = jax.random.normal(k_g, (600, G), dtype=jnp.float32)
    ub = jax.random.normal(k_u, (600, U), dtype=jnp.float32)
    outb = jax.block_until_ready(dynamics_forward(gb, ub, w_dyn, w_u))
    assert jnp.allclose(outb, gb @ w_dyn.T + ub @ w_u.T, atol=1e-4, rtol=1e-5)

    print("KERNEL_OK")
</pallas_src>

<mosaic_0001>
module attributes {stable_mosaic.version = 11 : i64} {
  func.func @_fused_dynamics_kernel(%arg0: i32, %arg1: memref<8x128xf32, #tpu.memory_space<vmem>>, %arg2: memref<128x128xf32, #tpu.memory_space<vmem>>, %arg3: memref<8x128xf32, #tpu.memory_space<vmem>>) attributes {dimension_semantics = [#tpu.dimension_semantics<parallel>], iteration_bounds = array<i64: 1>, scalar_prefetch = 0 : i64, scratch_operands = 0 : i64, tpu.core_type = #tpu.core_type<tc>, window_params = [{transform_indices = @transform_0, window_bounds = array<i64: 8, 128>}, {pipeline_mode = #tpu.pipeline_mode<synchronous>, transform_indices = @transform_1, window_bounds = array<i64: 128, 128>}, {transform_indices = @transform_2, window_bounds = array<i64: 8, 128>}]} {
    %c0 = arith.constant 0 : index
    %c0_0 = arith.constant 0 : index
    %0 = vector.load %arg1[%c0, %c0_0] : memref<8x128xf32, #tpu.memory_space<vmem>>, vector<8x128xf32>
    %c0_1 = arith.constant 0 : index
    %c0_2 = arith.constant 0 : index
    %1 = vector.load %arg2[%c0_1, %c0_2] : memref<128x128xf32, #tpu.memory_space<vmem>>, vector<128x128xf32>
    %cst = arith.constant dense<0.000000e+00> : vector<8x128xf32>
    %2 = tpu.matmul %0, %1, %cst {dimension_numbers = #tpu.dot_dimension_numbers<[1], [0], [0], [1], [0, 0, 1, 1], [], []>} : vector<8x128xf32>, vector<128x128xf32>, vector<8x128xf32> -> vector<8x128xf32>
    %c0_3 = arith.constant 0 : index
    %c0_4 = arith.constant 0 : index
    %3 = vector.load %arg3[%c0_3, %c0_4] : memref<8x128xf32, #tpu.memory_space<vmem>>, vector<8x128xf32>
    tpu.vector_store %arg3[%c0_3, %c0_4], %2 {strides = array<i32>} : memref<8x128xf32, #tpu.memory_space<vmem>>, vector<8x128xf32>,
    return
  }
  func.func @transform_0(%arg0: i32) -> (i32, i32) {
    %c0_i32 = arith.constant 0 : i32
    %c0_i32_0 = arith.constant 0 : i32
    return %arg0, %c0_i32 : i32, i32
  }
  func.func @transform_1(%arg0: i32) -> (i32, i32) {
    %c0_i32 = arith.constant 0 : i32
    %c0_i32_0 = arith.constant 0 : i32
    %c0_i32_1 = arith.constant 0 : i32
    return %c0_i32, %c0_i32_0 : i32, i32
  }
  func.func @transform_2(%arg0: i32) -> (i32, i32) {
    %c0_i32 = arith.constant 0 : i32
    %c0_i32_0 = arith.constant 0 : i32
    return %arg0, %c0_i32 : i32, i32
  }
}

</mosaic_0001>

<bundles_post_ra>
// kernel: _dynamics_forward_impl.1
= control target key start
LH: loop header
LB: loop body
LE: loop exit
PB: predicated region body
PF: predicated region fallthrough
CT: control target
= control target key end

     0   :  { %s163_s0 = inlined_call_operand.vmem [shape: f32[8,128], index: 0, kind: input, shape index: {}]   ;;  %s164_s1 = inlined_call_operand.vmem [shape: f32[128,128], index: 1, kind: input, shape index: {}]   ;;  %s165_s2 = inlined_call_operand.hbm [shape: f32[8,128], index: 2, kind: output, shape index: {}]  }
   0x1   :  { %v28_v0 = vld [vmem:[%s164_s1 + $0x78] sm:$0xff]  ;;  %v27_v1 = vld [vmem:[%s164_s1 + $0x70] sm:$0xff]  ;;  %v26_v2 = vld [vmem:[%s164_s1 + $0x68] sm:$0xff] }
   0x2   :  { %29 = vmatpush.msra.mxu0 %v28_v0  ;;  %v25_v3 = vld [vmem:[%s164_s1 + $0x60] sm:$0xff] }
   0x4   :  { %30 = vmatpush.msra.mxu0 %v27_v1 }
   0x6   :  { %31 = vmatpush.msra.mxu0 %v26_v2 }
   0x7   :  { %7 = vsyncpa [#allocation3], 0  ;;  %v24_v4 = vld [vmem:[%s164_s1 + $0x58] sm:$0xff]  ;;  %v23_v5 = vld [vmem:[%s164_s1 + $0x50] sm:$0xff]  ;;  %s93_s15 = smov [#allocation2]   ;;  %s57_s19 = sshll.u32 %s165_s2, 4  ;;  %s58_s19 = int_to_ptr.hbm [resolvable:$true] %s57_s19 }
   0x8   :  { %32 = vmatpush.msra.mxu0 %v25_v3  ;;  %v22_v6 = vld [vmem:[%s164_s1 + $0x48] sm:$0xff]  ;;  %v21_v7 = vld [vmem:[%s164_s1 + $0x40] sm:$0xff]  ;;  %v20_v8 = vld [vmem:[%s164_s1 + $0x38] sm:$0xff]  ;;  %s55_s16 = sshll.u32 %s93_s15, 4  ;;  %s56_s16 = int_to_ptr.vmem [resolvable:$true] %s55_s16 }
   0x9   :  { %v19_v9 = vld [vmem:[%s164_s1 + $0x30] sm:$0xff]  ;;  %v18_v10 = vld [vmem:[%s164_s1 + $0x28] sm:$0xff]  ;;  %v17_v11 = vld [vmem:[%s164_s1 + $0x20] sm:$0xff] }
   0xa   :  { %33 = vmatpush.msra.mxu0 %v24_v4  ;;  %v16_v12 = vld [vmem:[%s164_s1 + $0x18] sm:$0xff]  ;;  %v15_v13 = vld [vmem:[%s164_s1 + $0x10] sm:$0xff]  ;;  %v14_v14 = vld [vmem:[%s164_s1 + $0x8] sm:$0xff] }
   0xb   :  { %v13_v15 = vld [vmem:[%s164_s1] sm:$0xff] }
   0xc   :  { %34 = vmatpush.msra.mxu0 %v23_v5  ;;  %v12_v16 = vld [vmem:[%s163_s0] sm:$0xff] }
   0xe   :  { %35 = vmatpush.msra.mxu0 %v22_v6 }
  0x10   :  { %36 = vmatpush.msra.mxu0 %v21_v7 }
  0x12   :  { %37 = vmatpush.msra.mxu0 %v20_v8 }
  0x14   :  { %38 = vmatpush.msra.mxu0 %v19_v9 }
  0x16   :  { %39 = vmatpush.msra.mxu0 %v18_v10 }
  0x18   :  { %40 = vmatpush.msra.mxu0 %v17_v11 }
  0x1a   :  { %41 = vmatpush.msra.mxu0 %v16_v12 }
  0x1c   :  { %42 = vmatpush.msra.mxu0 %v15_v13 }
  0x1e   :  { %43 = vmatpush.msra.mxu0 %v14_v14 }
  0x20   :  { %44 = vmatpush.msra.mxu0 %v13_v15 }
  0x21   :  { %45 = vmatmul.f32.vlgmr.msra.gmra.mxu0 %v12_v16 }
  0x9e   :  { %v46_v17 = vpop.f32.mrf.mxu0 }
  0x9f   :  { %49 = vst [vmem:[#allocation2] sm:$0xff] %v46_v17 }
  0xa0   :  { %60 = dma.vmem_to_hbm [thread:$0]  %s56_s16, 128, %s58_s19, [#allocation3]  }
  0xa1   :  { %91 = dma.done.wait [#allocation3], 128  }
  0xa2   :  { %92 = vsyncadd [#allocation3], 4294967168 }
  0xa3   :  { %65 = vsyncpa [#allocation3], 1 }

</bundles_post_ra>
